<compile_context>
chip_gen: v7x
topology: tpu7x:2x2x1
jax: 0.10.0
libtpu: 0.0.40
codegen_flags: <defaults>
</compile_context>

<pallas_src>
import math

import jax
import jax.numpy as jnp
import numpy as np
from jax import lax
from jax.experimental import pallas as pl
from jax.experimental.pallas import tpu as pltpu

# hp.* chosen so the module is self-consistent:
# nn.MultiheadAttention(embed_dim=128, num_heads=H, kdim=128(default), vdim=d_k)
# type-checks only if d_k = token_emb_size // num_heads == 128.
TOKEN_NUM = 10
NUM_HEADS = 8
TOKEN_EMB_SIZE = 128 * NUM_HEADS          # 1024
D_K = TOKEN_EMB_SIZE // NUM_HEADS         # 128 == embed_dim == kdim == vdim
EMBED_DIM = 128
HEAD_DIM = EMBED_DIM // NUM_HEADS         # 16
T_PAD = 16                                # tokens padded per head block (H*T_PAD = 128 lanes)
SCORE_W = NUM_HEADS * T_PAD               # 128 = width of fused score slab
ATTN_PAD = 128                            # lane-dense width of attention-weight output


def _round_up(x, m):
    return ((x + m - 1) // m) * m


def _stl_kernel(x_ref, wq_ref, bq_ref, kbd_ref, vbd_ref, bsum_ref, avg_ref,
                wo_ref, bo_ref, out_ref, attn_ref):
    # x_ref: (TILE_N, E) batch tile of queries. All other inputs are constant
    # across the grid (index_map -> (0,0)), so they are DMA'd once.
    x = x_ref[...]

    # Q projection (scale 1/sqrt(Dh) pre-folded into Wq^T / bq in the wrapper).
    q = jnp.dot(x, wq_ref[...], preferred_element_type=jnp.float32) + bq_ref[...]

    # Fused per-head scores via block-diagonal K packing:
    # s[n, h*T_PAD + t] = q_h[n] . k_{h,t}   (padded t columns are exactly 0).
    s = jnp.dot(q, kbd_ref[...], preferred_element_type=jnp.float32)       # (TILE_N, 128)

    col = lax.broadcasted_iota(jnp.int32, s.shape, 1)
    valid = (col % T_PAD) < TOKEN_NUM

    # Row-global max over valid columns. Subtracting a per-row constant leaves
    # the per-head softmax exactly invariant; scores here are O(1) so this is
    # numerically safe and avoids per-block cross-lane reductions.
    neg = jnp.float32(-1e30)
    m = jnp.max(jnp.where(valid, s, neg), axis=-1, keepdims=True)
    e = jnp.where(valid, jnp.exp(s - m), 0.0)                               # (TILE_N, 128)

    # Per-head softmax denominator, broadcast back to every lane of its block,
    # via one matmul with a block-diagonal matrix of ones.
    denom = jnp.dot(e, bsum_ref[...], preferred_element_type=jnp.float32)   # (TILE_N, 128)
    p = e * pl.reciprocal(denom, approx=True)                               # softmax probs

    # Context via block-diagonal V packing: ctx[n, h*Dh + d] = sum_t p_h[n,t] v_{h,t,d}
    ctx = jnp.dot(p, vbd_ref[...], preferred_element_type=jnp.float32)      # (TILE_N, E)

    # Output projection.
    out_ref[...] = (jnp.dot(ctx, wo_ref[...], preferred_element_type=jnp.float32)
                    + bo_ref[...])

    # Head-averaged attention weights, written lane-dense (padded to 128 cols).
    attn_ref[...] = jnp.dot(p, avg_ref[...], preferred_element_type=jnp.float32)


def _build_packed(params):
    """Hoist all batch-independent work: tanh(embed), K/V projections, head
    fusion (block-diagonal packing), scale folding, softmax-sum and head-avg
    matrices. Pure JAX, runs once per call outside the grid."""
    E, H, Dh, T, Tp = EMBED_DIM, NUM_HEADS, HEAD_DIM, TOKEN_NUM, T_PAD
    scale = 1.0 / math.sqrt(Dh)
    f32 = jnp.float32

    wq_t = (params["wq"].astype(f32) * scale).T                 # (E, E)
    bq = (params["bq"].astype(f32) * scale).reshape(1, E)
    wo_t = params["wo"].astype(f32).T                           # (E, E)
    bo = params["bo"].astype(f32).reshape(1, E)

    kv = jnp.tanh(params["embed"].astype(f32))                  # (T, E)
    k = kv @ params["wk"].astype(f32).T + params["bk"].astype(f32)   # (T, E)
    v = kv @ params["wv"].astype(f32).T + params["bv"].astype(f32)   # (T, E)

    eye_h = jnp.eye(H, dtype=f32)

    # K_bd[h*Dh + d, h*Tp + t] = k[t, h*Dh + d] for t < T, else 0.
    k_hdT = jnp.transpose(k.reshape(T, H, Dh), (1, 2, 0))       # (H, Dh, T)
    k_hdT = jnp.pad(k_hdT, ((0, 0), (0, 0), (0, Tp - T)))       # (H, Dh, Tp)
    k_bd = jnp.einsum("hdt,hg->hdgt", k_hdT, eye_h).reshape(H * Dh, H * Tp)

    # V_bd[h*Tp + t, h*Dh + d] = v[t, h*Dh + d] for t < T, else 0.
    v_htd = jnp.transpose(v.reshape(T, H, Dh), (1, 0, 2))       # (H, T, Dh)
    v_htd = jnp.pad(v_htd, ((0, 0), (0, Tp - T), (0, 0)))       # (H, Tp, Dh)
    v_bd = jnp.einsum("htd,hg->htgd", v_htd, eye_h).reshape(H * Tp, H * Dh)

    # Block-diagonal ones: B[i, j] = 1 iff i and j are in the same head block.
    idx = jnp.arange(H * Tp)
    b_sum = (idx[:, None] // Tp == idx[None, :] // Tp).astype(f32)

    # Head-average matrix: A[h*Tp + t, t] = 1/H for t < T (lane-dense output).
    t_of_row = idx % Tp
    a_avg = ((t_of_row[:, None] == jnp.arange(ATTN_PAD)[None, :])
             & (t_of_row[:, None] < T)).astype(f32) / H          # (128, 128)

    return dict(wq_t=wq_t, bq=bq, wo_t=wo_t, bo=bo,
                k_bd=k_bd, v_bd=v_bd, b_sum=b_sum, a_avg=a_avg)


def stl_forward(x, params, tile_n=256):
    """x: [N, EMBED_DIM] float32. Returns (attn_output [N,1,E], attn_weights [N,1,T])."""
    N, E = x.shape
    assert E == EMBED_DIM
    T = TOKEN_NUM

    packed = _build_packed(params)

    # Batch tile: multiple of 8 sublanes; 256 amortizes per-step overhead and
    # fills the MXU on v6e/v7x (128 would suffice on v5e). Don't over-pad tiny
    # batches.
    tile = min(tile_n, _round_up(max(N, 1), 8))
    n_pad = _round_up(N, tile)
    x_p = jnp.zeros((n_pad, E), jnp.float32).at[:N].set(x.astype(jnp.float32))

    const2d = lambda i: (0, 0)  # noqa: E731  (same weight block for every batch tile)
    out, attn = pl.pallas_call(
        _stl_kernel,
        out_shape=(jax.ShapeDtypeStruct((n_pad, E), jnp.float32),
                   jax.ShapeDtypeStruct((n_pad, ATTN_PAD), jnp.float32)),
        grid=(n_pad // tile,),
        in_specs=[
            pl.BlockSpec((tile, E), lambda i: (i, 0)),          # query tile
            pl.BlockSpec((E, E), const2d),                      # Wq^T (scaled)
            pl.BlockSpec((1, E), const2d),                      # bq   (scaled)
            pl.BlockSpec((E, SCORE_W), const2d),                # block-diag K
            pl.BlockSpec((SCORE_W, E), const2d),                # block-diag V
            pl.BlockSpec((SCORE_W, SCORE_W), const2d),          # block-sum ones
            pl.BlockSpec((SCORE_W, ATTN_PAD), const2d),         # head-avg matrix
            pl.BlockSpec((E, E), const2d),                      # Wo^T
            pl.BlockSpec((1, E), const2d),                      # bo
        ],
        out_specs=(pl.BlockSpec((tile, E), lambda i: (i, 0)),
                   pl.BlockSpec((tile, ATTN_PAD), lambda i: (i, 0))),
        compiler_params=pltpu.CompilerParams(
            dimension_semantics=("parallel",)),
    )(x_p, packed["wq_t"], packed["bq"], packed["k_bd"], packed["v_bd"],
      packed["b_sum"], packed["a_avg"], packed["wo_t"], packed["bo"])

    return out[:N].reshape(N, 1, E), attn[:N, :T].reshape(N, 1, T)


def stl_reference(x, params):
    """Pure-JAX reference of the same multi-head cross-attention."""
    N, E = x.shape
    kv = jnp.tanh(params["embed"])                               # (T, E)
    q = x @ params["wq"].T + params["bq"]                        # (N, E)
    k = kv @ params["wk"].T + params["bk"]                       # (T, E)
    v = kv @ params["wv"].T + params["bv"]                       # (T, E)
    qh = q.reshape(N, NUM_HEADS, HEAD_DIM)
    kh = k.reshape(-1, NUM_HEADS, HEAD_DIM)
    vh = v.reshape(-1, NUM_HEADS, HEAD_DIM)
    s = jnp.einsum("nhd,thd->nht", qh, kh) / math.sqrt(HEAD_DIM)
    p = jax.nn.softmax(s, axis=-1)                               # (N, H, T)
    ctx = jnp.einsum("nht,thd->nhd", p, vh).reshape(N, E)
    out = ctx @ params["wo"].T + params["bo"]
    return out.reshape(N, 1, E), p.mean(axis=1).reshape(N, 1, -1)


def init_params(key):
    ks = jax.random.split(key, 10)
    f32 = jnp.float32
    std_w = 1.0 / math.sqrt(EMBED_DIM)
    return {
        # nn.Parameter(token_num, token_emb_size // num_heads), init N(0, 0.5)
        "embed": 0.5 * jax.random.normal(ks[0], (TOKEN_NUM, D_K), f32),
        # MultiheadAttention projections (synthetic deterministic init)
        "wq": std_w * jax.random.normal(ks[1], (EMBED_DIM, EMBED_DIM), f32),
        "wk": std_w * jax.random.normal(ks[2], (EMBED_DIM, EMBED_DIM), f32),
        "wv": std_w * jax.random.normal(ks[3], (EMBED_DIM, EMBED_DIM), f32),
        "bq": 0.01 * jax.random.normal(ks[4], (EMBED_DIM,), f32),
        "bk": 0.01 * jax.random.normal(ks[5], (EMBED_DIM,), f32),
        "bv": 0.01 * jax.random.normal(ks[6], (EMBED_DIM,), f32),
        "wo": std_w * jax.random.normal(ks[7], (EMBED_DIM, EMBED_DIM), f32),
        "bo": 0.01 * jax.random.normal(ks[8], (EMBED_DIM,), f32),
    }


if __name__ == "__main__":
    key = jax.random.PRNGKey(0)
    pkey, xkey = jax.random.split(key)
    params = init_params(pkey)

    N = 20
    x = jax.random.normal(xkey, (N, EMBED_DIM), jnp.float32)   # inputs [N, E//2] -> [N, 128]

    ref_out, ref_w = stl_reference(x, params)

    # Default tile (single grid step for this small batch).
    out, attn_w = jax.block_until_ready(stl_forward(x, params))
    assert out.shape == (N, 1, EMBED_DIM) and attn_w.shape == (N, 1, TOKEN_NUM)
    np.testing.assert_allclose(np.asarray(out), np.asarray(ref_out), rtol=1e-3, atol=1e-3)
    np.testing.assert_allclose(np.asarray(attn_w), np.asarray(ref_w), rtol=1e-3, atol=1e-3)

    # Small tile to exercise the multi-step (padded) grid path as well.
    out2, attn_w2 = jax.block_until_ready(stl_forward(x, params, tile_n=8))
    np.testing.assert_allclose(np.asarray(out2), np.asarray(ref_out), rtol=1e-3, atol=1e-3)
    np.testing.assert_allclose(np.asarray(attn_w2), np.asarray(ref_w), rtol=1e-3, atol=1e-3)

    print("KERNEL_OK")
</pallas_src>

<mosaic_0001>
module attributes {stable_mosaic.version = 11 : i64} {
  func.func @_stl_kernel(%arg0: i32, %arg1: memref<24x128xf32, #tpu.memory_space<vmem>>, %arg2: memref<128x128xf32, #tpu.memory_space<vmem>>, %arg3: memref<1x128xf32, #tpu.memory_space<vmem>>, %arg4: memref<128x128xf32, #tpu.memory_space<vmem>>, %arg5: memref<128x128xf32, #tpu.memory_space<vmem>>, %arg6: memref<128x128xf32, #tpu.memory_space<vmem>>, %arg7: memref<128x128xf32, #tpu.memory_space<vmem>>, %arg8: memref<128x128xf32, #tpu.memory_space<vmem>>, %arg9: memref<1x128xf32, #tpu.memory_space<vmem>>, %arg10: memref<24x128xf32, #tpu.memory_space<vmem>>, %arg11: memref<24x128xf32, #tpu.memory_space<vmem>>) attributes {dimension_semantics = [#tpu.dimension_semantics<parallel>], iteration_bounds = array<i64: 1>, scalar_prefetch = 0 : i64, scratch_operands = 0 : i64, tpu.core_type = #tpu.core_type<tc>, window_params = [{transform_indices = @transform_0, window_bounds = array<i64: 24, 128>}, {pipeline_mode = #tpu.pipeline_mode<synchronous>, transform_indices = @transform_1, window_bounds = array<i64: 128, 128>}, {pipeline_mode = #tpu.pipeline_mode<synchronous>, transform_indices = @transform_2, window_bounds = array<i64: 1, 128>}, {pipeline_mode = #tpu.pipeline_mode<synchronous>, transform_indices = @transform_3, window_bounds = array<i64: 128, 128>}, {pipeline_mode = #tpu.pipeline_mode<synchronous>, transform_indices = @transform_4, window_bounds = array<i64: 128, 128>}, {pipeline_mode = #tpu.pipeline_mode<synchronous>, transform_indices = @transform_5, window_bounds = array<i64: 128, 128>}, {pipeline_mode = #tpu.pipeline_mode<synchronous>, transform_indices = @transform_6, window_bounds = array<i64: 128, 128>}, {pipeline_mode = #tpu.pipeline_mode<synchronous>, transform_indices = @transform_7, window_bounds = array<i64: 128, 128>}, {pipeline_mode = #tpu.pipeline_mode<synchronous>, transform_indices = @transform_8, window_bounds = array<i64: 1, 128>}, {transform_indices = @transform_9, window_bounds = array<i64: 24, 128>}, {transform_indices = @transform_10, window_bounds = array<i64: 24, 128>}]} {
    %c0 = arith.constant 0 : index
    %c0_0 = arith.constant 0 : index
    %0 = vector.load %arg1[%c0, %c0_0] : memref<24x128xf32, #tpu.memory_space<vmem>>, vector<24x128xf32>
    %c0_1 = arith.constant 0 : index
    %c0_2 = arith.constant 0 : index
    %1 = vector.load %arg2[%c0_1, %c0_2] : memref<128x128xf32, #tpu.memory_space<vmem>>, vector<128x128xf32>
    %cst = arith.constant dense<0.000000e+00> : vector<24x128xf32>
    %2 = tpu.matmul %0, %1, %cst {dimension_numbers = #tpu.dot_dimension_numbers<[1], [0], [0], [1], [0, 0, 1, 1], [], []>} : vector<24x128xf32>, vector<128x128xf32>, vector<24x128xf32> -> vector<24x128xf32>
    %c0_3 = arith.constant 0 : index
    %c0_4 = arith.constant 0 : index
    %3 = vector.load %arg3[%c0_3, %c0_4] : memref<1x128xf32, #tpu.memory_space<vmem>>, vector<1x128xf32>
    %4 = vector.broadcast %3 : vector<1x128xf32> to vector<24x128xf32>
    %5 = arith.addf %2, %4 : vector<24x128xf32>
    %c0_5 = arith.constant 0 : index
    %c0_6 = arith.constant 0 : index
    %6 = vector.load %arg4[%c0_5, %c0_6] : memref<128x128xf32, #tpu.memory_space<vmem>>, vector<128x128xf32>
    %cst_7 = arith.constant dense<0.000000e+00> : vector<24x128xf32>
    %7 = tpu.matmul %5, %6, %cst_7 {dimension_numbers = #tpu.dot_dimension_numbers<[1], [0], [0], [1], [0, 0, 1, 1], [], []>} : vector<24x128xf32>, vector<128x128xf32>, vector<24x128xf32> -> vector<24x128xf32>
    %8 = tpu.iota {dimensions = array<i32: 1>} : vector<24x128xi32>
    %c16_i32 = arith.constant 16 : i32
    %c0_i32 = arith.constant 0 : i32
    %9 = arith.cmpi eq, %c16_i32, %c0_i32 : i32
    %c1_i32 = arith.constant 1 : i32
    %10 = arith.select %9, %c1_i32, %c16_i32 : i32
    %11 = vector.broadcast %10 : i32 to vector<24x128xi32>
    %12 = arith.remsi %8, %11 : vector<24x128xi32>
    %c0_i32_8 = arith.constant 0 : i32
    %13 = vector.broadcast %c0_i32_8 : i32 to vector<24x128xi32>
    %14 = arith.cmpi ne, %12, %13 : vector<24x128xi32>
    %c0_i32_9 = arith.constant 0 : i32
    %15 = vector.broadcast %c0_i32_9 : i32 to vector<24x128xi32>
    %16 = arith.cmpi slt, %12, %15 : vector<24x128xi32>
    %c0_i32_10 = arith.constant 0 : i32
    %17 = arith.cmpi slt, %10, %c0_i32_10 : i32
    %18 = vector.broadcast %17 : i1 to vector<24x128xi1>
    %19 = vector.broadcast %18 : vector<24x128xi1> to vector<24x128xi1>
    %20 = arith.xori %16, %19 : vector<24x128xi1>
    %21 = arith.andi %20, %14 : vector<24x128xi1>
    %22 = vector.broadcast %10 : i32 to vector<24x128xi32>
    %23 = arith.addi %12, %22 : vector<24x128xi32>
    %24 = arith.select %21, %23, %12 : vector<24x128xi1>, vector<24x128xi32>
    %c10_i32 = arith.constant 10 : i32
    %25 = vector.broadcast %c10_i32 : i32 to vector<24x128xi32>
    %26 = arith.cmpi slt, %24, %25 : vector<24x128xi32>
    %cst_11 = arith.constant -1.000000e+30 : f32
    %27 = vector.broadcast %cst_11 : f32 to vector<24x128xf32>
    %28 = arith.select %26, %7, %27 : vector<24x128xi1>, vector<24x128xf32>
    %cst_12 = arith.constant dense<0xFF800000> : vector<24xf32>
    %29 = vector.multi_reduction <maximumf>, %28, %cst_12 [1] : vector<24x128xf32> to vector<24xf32>
    %30 = vector.shape_cast %29 : vector<24xf32> to vector<24x1xf32>
    %31 = vector.broadcast %30 : vector<24x1xf32> to vector<24x128xf32>
    %32 = arith.subf %7, %31 : vector<24x128xf32>
    %33 = math.exp %32 : vector<24x128xf32>
    %cst_13 = arith.constant 0.000000e+00 : f32
    %34 = vector.broadcast %cst_13 : f32 to vector<24x128xf32>
    %35 = arith.select %26, %33, %34 : vector<24x128xi1>, vector<24x128xf32>
    %c0_14 = arith.constant 0 : index
    %c0_15 = arith.constant 0 : index
    %36 = vector.load %arg6[%c0_14, %c0_15] : memref<128x128xf32, #tpu.memory_space<vmem>>, vector<128x128xf32>
    %cst_16 = arith.constant dense<0.000000e+00> : vector<24x128xf32>
    %37 = tpu.matmul %35, %36, %cst_16 {dimension_numbers = #tpu.dot_dimension_numbers<[1], [0], [0], [1], [0, 0, 1, 1], [], []>} : vector<24x128xf32>, vector<128x128xf32>, vector<24x128xf32> -> vector<24x128xf32>
    %38 = tpu.reciprocal %37 {approx = true} : vector<24x128xf32> -> vector<24x128xf32>
    %39 = arith.mulf %35, %38 : vector<24x128xf32>
    %c0_17 = arith.constant 0 : index
    %c0_18 = arith.constant 0 : index
    %40 = vector.load %arg5[%c0_17, %c0_18] : memref<128x128xf32, #tpu.memory_space<vmem>>, vector<128x128xf32>
    %cst_19 = arith.constant dense<0.000000e+00> : vector<24x128xf32>
    %41 = tpu.matmul %39, %40, %cst_19 {dimension_numbers = #tpu.dot_dimension_numbers<[1], [0], [0], [1], [0, 0, 1, 1], [], []>} : vector<24x128xf32>, vector<128x128xf32>, vector<24x128xf32> -> vector<24x128xf32>
    %c0_20 = arith.constant 0 : index
    %c0_21 = arith.constant 0 : index
    %42 = vector.load %arg8[%c0_20, %c0_21] : memref<128x128xf32, #tpu.memory_space<vmem>>, vector<128x128xf32>
    %cst_22 = arith.constant dense<0.000000e+00> : vector<24x128xf32>
    %43 = tpu.matmul %41, %42, %cst_22 {dimension_numbers = #tpu.dot_dimension_numbers<[1], [0], [0], [1], [0, 0, 1, 1], [], []>} : vector<24x128xf32>, vector<128x128xf32>, vector<24x128xf32> -> vector<24x128xf32>
    %c0_23 = arith.constant 0 : index
    %c0_24 = arith.constant 0 : index
    %44 = vector.load %arg9[%c0_23, %c0_24] : memref<1x128xf32, #tpu.memory_space<vmem>>, vector<1x128xf32>
    %45 = vector.broadcast %44 : vector<1x128xf32> to vector<24x128xf32>
    %46 = arith.addf %43, %45 : vector<24x128xf32>
    %c0_25 = arith.constant 0 : index
    %c0_26 = arith.constant 0 : index
    %47 = vector.load %arg10[%c0_25, %c0_26] : memref<24x128xf32, #tpu.memory_space<vmem>>, vector<24x128xf32>
    tpu.vector_store %arg10[%c0_25, %c0_26], %46 {strides = array<i32>} : memref<24x128xf32, #tpu.memory_space<vmem>>, vector<24x128xf32>,
    %c0_27 = arith.constant 0 : index
    %c0_28 = arith.constant 0 : index
    %48 = vector.load %arg7[%c0_27, %c0_28] : memref<128x128xf32, #tpu.memory_space<vmem>>, vector<128x128xf32>
    %cst_29 = arith.constant dense<0.000000e+00> : vector<24x128xf32>
    %49 = tpu.matmul %39, %48, %cst_29 {dimension_numbers = #tpu.dot_dimension_numbers<[1], [0], [0], [1], [0, 0, 1, 1], [], []>} : vector<24x128xf32>, vector<128x128xf32>, vector<24x128xf32> -> vector<24x128xf32>
    %c0_30 = arith.constant 0 : index
    %c0_31 = arith.constant 0 : index
    %50 = vector.load %arg11[%c0_30, %c0_31] : memref<24x128xf32, #tpu.memory_space<vmem>>, vector<24x128xf32>
    tpu.vector_store %arg11[%c0_30, %c0_31], %49 {strides = array<i32>} : memref<24x128xf32, #tpu.memory_space<vmem>>, vector<24x128xf32>,
    return
  }
  func.func @transform_0(%arg0: i32) -> (i32, i32) {
    %c0_i32 = arith.constant 0 : i32
    %c0_i32_0 = arith.constant 0 : i32
    return %arg0, %c0_i32 : i32, i32
  }
  func.func @transform_1(%arg0: i32) -> (i32, i32) {
    %c0_i32 = arith.constant 0 : i32
    %c0_i32_0 = arith.constant 0 : i32
    %c0_i32_1 = arith.constant 0 : i32
    return %c0_i32, %c0_i32_0 : i32, i32
  }
  func.func @transform_2(%arg0: i32) -> (i32, i32) {
    %c0_i32 = arith.constant 0 : i32
    %c0_i32_0 = arith.constant 0 : i32
    %c0_i32_1 = arith.constant 0 : i32
    return %c0_i32, %c0_i32_0 : i32, i32
  }
  func.func @transform_3(%arg0: i32) -> (i32, i32) {
    %c0_i32 = arith.constant 0 : i32
    %c0_i32_0 = arith.constant 0 : i32
    %c0_i32_1 = arith.constant 0 : i32
    return %c0_i32, %c0_i32_0 : i32, i32
  }
  func.func @transform_4(%arg0: i32) -> (i32, i32) {
    %c0_i32 = arith.constant 0 : i32
    %c0_i32_0 = arith.constant 0 : i32
    %c0_i32_1 = arith.constant 0 : i32
    return %c0_i32, %c0_i32_0 : i32, i32
  }
  func.func @transform_5(%arg0: i32) -> (i32, i32) {
    %c0_i32 = arith.constant 0 : i32
    %c0_i32_0 = arith.constant 0 : i32
    %c0_i32_1 = arith.constant 0 : i32
    return %c0_i32, %c0_i32_0 : i32, i32
  }
  func.func @transform_6(%arg0: i32) -> (i32, i32) {
    %c0_i32 = arith.constant 0 : i32
    %c0_i32_0 = arith.constant 0 : i32
    %c0_i32_1 = arith.constant 0 : i32
    return %c0_i32, %c0_i32_0 : i32, i32
  }
  func.func @transform_7(%arg0: i32) -> (i32, i32) {
    %c0_i32 = arith.constant 0 : i32
    %c0_i32_0 = arith.constant 0 : i32
    %c0_i32_1 = arith.constant 0 : i32
    return %c0_i32, %c0_i32_0 : i32, i32
  }
  func.func @transform_8(%arg0: i32) -> (i32, i32) {
    %c0_i32 = arith.constant 0 : i32
    %c0_i32_0 = arith.constant 0 : i32
    %c0_i32_1 = arith.constant 0 : i32
    return %c0_i32, %c0_i32_0 : i32, i32
  }
  func.func @transform_9(%arg0: i32) -> (i32, i32) {
    %c0_i32 = arith.constant 0 : i32
    %c0_i32_0 = arith.constant 0 : i32
    return %arg0, %c0_i32 : i32, i32
  }
  func.func @transform_10(%arg0: i32) -> (i32, i32) {
    %c0_i32 = arith.constant 0 : i32
    %c0_i32_0 = arith.constant 0 : i32
    return %arg0, %c0_i32 : i32, i32
  }
}

</mosaic_0001>

<bundles_post_ra>
// kernel: tpu_custom_call.1
= control target key start
LH: loop header
LB: loop body
LE: loop exit
PB: predicated region body
PF: predicated region fallthrough
CT: control target
= control target key end

     0   :  { %16 = vsyncpa [#allocation3], 0  ;;  %s1902_s0 = inlined_call_operand.hbm [shape: f32[24,128], index: 0, kind: input, shape index: {}]   ;;  %s1903_s1 = inlined_call_operand.hbm [shape: f32[128,128], index: 1, kind: input, shape index: {}]   ;;  %s1904_s2 = inlined_call_operand.vmem [shape: f32[1,128], index: 2, kind: input, shape index: {}]   ;;  %s1905_s3 = inlined_call_operand.hbm [shape: f32[128,128], index: 3, kind: input, shape index: {}]   ;;  %s1906_s4 = inlined_call_operand.hbm [shape: f32[128,128], index: 4, kind: input, shape index: {}]   ;;  %s1907_s5 = inlined_call_operand.hbm [shape: f32[128,128], index: 5, kind: input, shape index: {}]   ;;  %s1908_s6 = inlined_call_operand.hbm [shape: f32[128,128], index: 6, kind: input, shape index: {}]   ;;  %s1909_s7 = inlined_call_operand.hbm [shape: f32[128,128], index: 7, kind: input, shape index: {}]   ;;  %s1910_s8 = inlined_call_operand.vmem [shape: f32[1,128], index: 8, kind: input, shape index: {}]   ;;  %s1911_s9 = inlined_call_operand.hbm [shape: f32[24,128], index: 9, kind: output, shape index: {0}]   ;;  %s1912_s10 = inlined_call_operand.hbm [shape: f32[24,128], index: 10, kind: output, shape index: {1}]  }
   0x1   :  { %17 = vsyncpa [#allocation6], 0 }
   0x2   :  { %18 = vsyncpa [#allocation9], 0 }
   0x3   :  { %19 = vsyncpa [#allocation12], 0 }
   0x4   :  { %20 = vsyncpa [#allocation4], 0 }
   0x5   :  { %21 = vsyncpa [#allocation16], 0  ;;  %s1553_s13 = smov [#allocation5]   ;;  %s1554_s15 = smov [#allocation8]  }
   0x6   :  { %s39_s14 = sshll.u32 %s1553_s13, 4  ;;  %s65_s16 = sshll.u32 %s1554_s15, 4  ;;  %s40_s14 = int_to_ptr.vmem [resolvable:$true] %s39_s14  ;;  %s1622_s16 = int_to_ptr.vmem [resolvable:$true] %s65_s16 }
   0x7   :  { %s1343_s19 = scalar_lea.hbm %s1903_s1, 2048 }
   0x8   :  { %p1344_p0 = scmp.ne.s32.totalorder %s1903_s1, %s1343_s19  ;;  %p1347_p1 = scmp.lt.u32.totalorder %s1343_s19, %s1903_s1 }
   0xa   :  { %p1349_p2 = pnand %p1347_p1, %p1344_p0 }
   0xc   :  { %1352 = shalt.err (!%p1349_p2)
}
   0xd   :  { %s1353_s24 = scalar_lea.vmem %s40_s14, 2048  ;;  %p1358_p4 = scmp.lt.s32.totalorder %s40_s14, %s40_s14 }
   0xe   :  { %p1354_p3 = scmp.ne.s32.totalorder %s40_s14, %s1353_s24  ;;  %p1359_p5 = scmp.lt.s32.totalorder %s1353_s24, %s1353_s24 }
  0x10   :  { %p1360_p6 = por %p1359_p5, %p1358_p4 }
  0x12   :  { %p1361_p7 = pnand %p1360_p6, %p1354_p3 }
  0x14   :  { %1364 = shalt.err (!%p1361_p7)
}
  0x15   :  { %s1555_s25 = smov 128   ;;  %s1556_s26 = smov 8  }
  0x16   :  { %45 = dma.hbm_to_vmem [thread:$0]  %s1903_s1, 2048, %s40_s14, [#allocation6], %s1555_s25, %s1555_s25, %s1556_s26  }
  0x17   :  { %s1365_s11 = scalar_lea.hbm %s1906_s4, 2048 }
  0x18   :  { %p1366_p8 = scmp.ne.s32.totalorder %s1906_s4, %s1365_s11  ;;  %p1369_p9 = scmp.lt.u32.totalorder %s1365_s11, %s1906_s4 }
  0x1a   :  { %p1371_p10 = pnand %p1369_p9, %p1366_p8 }
  0x1c   :  { %1374 = shalt.err (!%p1371_p10)
}
  0x1d   :  { %s1375_s18 = scalar_lea.vmem %s1622_s16, 2048  ;;  %p1380_p12 = scmp.lt.s32.totalorder %s1622_s16, %s1622_s16 }
  0x1e   :  { %p1376_p11 = scmp.ne.s32.totalorder %s1622_s16, %s1375_s18  ;;  %p1381_p13 = scmp.lt.s32.totalorder %s1375_s18, %s1375_s18 }
  0x20   :  { %p1382_p0 = por %p1381_p13, %p1380_p12 }
  0x22   :  { %p1383_p1 = pnand %p1382_p0, %p1376_p11 }
  0x24   :  { %1386 = shalt.err (!%p1383_p1)
}
  0x25   :  { %71 = dma.hbm_to_vmem [thread:$0]  %s1906_s4, 2048, %s1622_s16, [#allocation9], %s1555_s25, %s1555_s25, %s1556_s26  }
  0x26   :  { %s1557_s19 = smov [#allocation11]   ;;  %s1558_s21 = smov [#allocation2]  }
  0x27   :  { %s89_s20 = sshll.u32 %s1557_s19, 4  ;;  %s27_s22 = sshll.u32 %s1558_s21, 4  ;;  %s90_s20 = int_to_ptr.vmem [resolvable:$true] %s89_s20  ;;  %s1659_s22 = int_to_ptr.vmem [resolvable:$true] %s27_s22 }
  0x28   :  { %s1387_s27 = scalar_lea.hbm %s1908_s6, 2048 }
  0x29   :  { %p1388_p2 = scmp.ne.s32.totalorder %s1908_s6, %s1387_s27  ;;  %p1391_p3 = scmp.lt.u32.totalorder %s1387_s27, %s1908_s6 }
  0x2b   :  { %p1393_p4 = pnand %p1391_p3, %p1388_p2 }
  0x2d   :  { %1396 = shalt.err (!%p1393_p4)
}
  0x2e   :  { %s1397_s4 = scalar_lea.vmem %s90_s20, 2048  ;;  %p1402_p6 = scmp.lt.s32.totalorder %s90_s20, %s90_s20 }
  0x2f   :  { %p1398_p5 = scmp.ne.s32.totalorder %s90_s20, %s1397_s4  ;;  %p1403_p7 = scmp.lt.s32.totalorder %s1397_s4, %s1397_s4 }
  0x31   :  { %p1404_p8 = por %p1403_p7, %p1402_p6 }
  0x33   :  { %p1405_p9 = pnand %p1404_p8, %p1398_p5 }
  0x35   :  { %1408 = shalt.err (!%p1405_p9)
}
  0x36   :  { %95 = dma.hbm_to_vmem [thread:$0]  %s1908_s6, 2048, %s90_s20, [#allocation12], %s1555_s25, %s1555_s25, %s1556_s26  }
  0x37   :  { %s1409_s17 = scalar_lea.hbm %s1902_s0, 384 }
  0x38   :  { %p1410_p10 = scmp.ne.s32.totalorder %s1902_s0, %s1409_s17  ;;  %p1413_p11 = scmp.lt.u32.totalorder %s1409_s17, %s1902_s0 }
  0x3a   :  { %p1415_p12 = pnand %p1413_p11, %p1410_p10 }
  0x3c   :  { %1418 = shalt.err (!%p1415_p12)
}
  0x3d   :  { %s1419_s21 = scalar_lea.vmem %s1659_s22, 384  ;;  %p1424_p0 = scmp.lt.s32.totalorder %s1659_s22, %s1659_s22 }
  0x3e   :  { %p1420_p13 = scmp.ne.s32.totalorder %s1659_s22, %s1419_s21  ;;  %p1425_p1 = scmp.lt.s32.totalorder %s1419_s21, %s1419_s21 }
  0x40   :  { %p1426_p2 = por %p1425_p1, %p1424_p0 }
  0x42   :  { %p1427_p3 = pnand %p1426_p2, %p1420_p13 }
  0x44   :  { %1430 = shalt.err (!%p1427_p3)
}
  0x45   :  { %33 = dma.hbm_to_vmem [thread:$0]  %s1902_s0, 384, %s1659_s22, [#allocation3], %s1555_s25, %s1555_s25, %s1556_s26  }
  0x46   :  { %s1559_s23 = smov [#allocation7]   ;;  %s1560_s27 = smov [#allocation10]  }
  0x47   :  { %s53_s24 = sshll.u32 %s1559_s23, 4  ;;  %s77_s28 = sshll.u32 %s1560_s27, 4  ;;  %s54_s24 = int_to_ptr.vmem [resolvable:$true] %s53_s24  ;;  %s1696_s28 = int_to_ptr.vmem [resolvable:$true] %s77_s28 }
  0x48   :  { %s1431_s11 = scalar_lea.hbm %s1905_s3, 2048 }
  0x49   :  { %p1432_p4 = scmp.ne.s32.totalorder %s1905_s3, %s1431_s11  ;;  %p1435_p5 = scmp.lt.u32.totalorder %s1431_s11, %s1905_s3 }
  0x4b   :  { %p1437_p6 = pnand %p1435_p5, %p1432_p4 }
  0x4d   :  { %1440 = shalt.err (!%p1437_p6)
}
  0x4e   :  { %s1441_s0 = scalar_lea.vmem %s54_s24, 2048  ;;  %p1446_p8 = scmp.lt.s32.totalorder %s54_s24, %s54_s24 }
  0x4f   :  { %p1442_p7 = scmp.ne.s32.totalorder %s54_s24, %s1441_s0  ;;  %p1447_p9 = scmp.lt.s32.totalorder %s1441_s0, %s1441_s0 }
  0x51   :  { %p1448_p10 = por %p1447_p9, %p1446_p8 }
  0x53   :  { %p1449_p11 = pnand %p1448_p10, %p1442_p7 }
  0x55   :  { %1452 = shalt.err (!%p1449_p11)
}
  0x56   :  { %59 = dma.hbm_to_vmem [thread:$0]  %s1905_s3, 2048, %s54_s24, [#allocation6], %s1555_s25, %s1555_s25, %s1556_s26  }
  0x57   :  { %s1453_s1 = scalar_lea.hbm %s1907_s5, 2048 }
  0x58   :  { %p1454_p12 = scmp.ne.s32.totalorder %s1907_s5, %s1453_s1  ;;  %p1457_p13 = scmp.lt.u32.totalorder %s1453_s1, %s1907_s5 }
  0x5a   :  { %p1459_p0 = pnand %p1457_p13, %p1454_p12 }
  0x5c   :  { %1462 = shalt.err (!%p1459_p0)
}
  0x5d   :  { %s1463_s20 = scalar_lea.vmem %s1696_s28, 2048  ;;  %p1468_p2 = scmp.lt.s32.totalorder %s1696_s28, %s1696_s28 }
  0x5e   :  { %p1464_p1 = scmp.ne.s32.totalorder %s1696_s28, %s1463_s20  ;;  %p1469_p3 = scmp.lt.s32.totalorder %s1463_s20, %s1463_s20 }
  0x60   :  { %p1470_p4 = por %p1469_p3, %p1468_p2 }
  0x62   :  { %p1471_p5 = pnand %p1470_p4, %p1464_p1 }
  0x64   :  { %1474 = shalt.err (!%p1471_p5)
}
  0x65   :  { %83 = dma.hbm_to_vmem [thread:$0]  %s1907_s5, 2048, %s1696_s28, [#allocation9], %s1555_s25, %s1555_s25, %s1556_s26  }
  0x66   :  { %s1561_s24 = smov [#allocation13]   ;;  %s1475_s11 = scalar_lea.hbm %s1909_s7, 2048 }
  0x67   :  { %s101_s27 = sshll.u32 %s1561_s24, 4  ;;  %p1476_p6 = scmp.ne.s32.totalorder %s1909_s7, %s1475_s11  ;;  %s102_s27 = int_to_ptr.vmem [resolvable:$true] %s101_s27 }
  0x68   :  { %p1479_p7 = scmp.lt.u32.totalorder %s1475_s11, %s1909_s7 }
  0x6a   :  { %p1481_p8 = pnand %p1479_p7, %p1476_p6 }
  0x6c   :  { %1484 = shalt.err (!%p1481_p8)
}
  0x6d   :  { %s1485_s0 = scalar_lea.vmem %s102_s27, 2048  ;;  %p1490_p10 = scmp.lt.s32.totalorder %s102_s27, %s102_s27 }
  0x6e   :  { %p1486_p9 = scmp.ne.s32.totalorder %s102_s27, %s1485_s0  ;;  %p1491_p11 = scmp.lt.s32.totalorder %s1485_s0, %s1485_s0 }
  0x70   :  { %p1492_p12 = por %p1491_p11, %p1490_p10 }
  0x72   :  { %p1493_p13 = pnand %p1492_p12, %p1486_p9 }
  0x74   :  { %1496 = shalt.err (!%p1493_p13)
}
  0x75   :  { %107 = dma.hbm_to_vmem [thread:$0]  %s1909_s7, 2048, %s102_s27, [#allocation12], %s1555_s25, %s1555_s25, %s1556_s26  }
  0x76   :  { %1541 = dma.done.wait [#allocation3], 384  }
  0x77   :  { %1542 = vsyncadd [#allocation3], 4294966912 }
  0x78   :  { %1543 = dma.done.wait [#allocation6], 4096  }
  0x79   :  { %1544 = vsyncadd [#allocation6], 4294963200 }
  0x7a   :  { %1545 = dma.done.wait [#allocation9], 4096  }
  0x7b   :  { %1546 = vsyncadd [#allocation9], 4294963200 }
  0x7c   :  { %1547 = dma.done.wait [#allocation12], 4096  }
  0x7d   :  { %1548 = vsyncadd [#allocation12], 4294963200  ;;  %v1562_v0 = vmov 0.0|0.0   ;;  %vm1563_vm0 = vmmov 0   ;;  %v1564_v1 = vmov 0.0   ;;  %v134_v2 = vld [vmem:[#allocation5] sm:$0xff] }
  0x7e   :  { %1173 = vmatprep.subr.bf16.mxu0 %v1562_v0  ;;  %959 = vmatprep.mubr.msk.f32.mxu0 %vm1563_vm0, %v1564_v1  ;;  %v135_v3 = vld [vmem:[#allocation5 + $0x8] sm:$0xff]  ;;  %v136_v4 = vld [vmem:[#allocation5 + $0x10] sm:$0xff]  ;;  %v137_v6 = vld [vmem:[#allocation5 + $0x18] sm:$0xff] }
  0x7f   :  { %1197 = vmatprep.subr.bf16.mxu1 %v1562_v0  ;;  %1000 = vmatprep.mubr.msk.f32.mxu1 %vm1563_vm0, %v1564_v1  ;;  %v1174_v5 = vpack.c.bf16 %v135_v3, %v134_v2  ;;  %v1177_v7 = vpack.c.bf16 %v137_v6, %v136_v4  ;;  %v138_v8 = vld [vmem:[#allocation5 + $0x20] sm:$0xff]  ;;  %v139_v9 = vld [vmem:[#allocation5 + $0x28] sm:$0xff]  ;;  %v239_v14 = vld [vmem:[#allocation7 + $0x10] sm:$0xff] }
  0x80   :  { %v237_v10 = vld [vmem:[#allocation7] sm:$0xff]  ;;  %v238_v11 = vld [vmem:[#allocation7 + $0x8] sm:$0xff]  ;;  %v1180_v12 = vpack.c.bf16 %v139_v9, %v138_v8  ;;  %v240_v15 = vld [vmem:[#allocation7 + $0x18] sm:$0xff] }
  0x81   :  { %1175 = vmatpush3.bf16.msra.mxu0 %v1174_v5  ;;  %v1198_v13 = vpack.c.bf16 %v238_v11, %v237_v10  ;;  %v140_v16 = vld [vmem:[#allocation5 + $0x30] sm:$0xff]  ;;  %v141_v17 = vld [vmem:[#allocation5 + $0x38] sm:$0xff]  ;;  %v1201_v18 = vpack.c.bf16 %v240_v15, %v239_v14  ;;  %v241_v19 = vld [vmem:[#allocation7 + $0x20] sm:$0xff] }
  0x82   :  { %1176 = vmatprep.subr.bf16.mxu0 %v1562_v0  ;;  %v242_v20 = vld [vmem:[#allocation7 + $0x28] sm:$0xff]  ;;  %v1183_v21 = vpack.c.bf16 %v141_v17, %v140_v16  ;;  %v142_v22 = vld [vmem:[#allocation5 + $0x40] sm:$0xff]  ;;  %v243_v25 = vld [vmem:[#allocation7 + $0x30] sm:$0xff] }
  0x83   :  { %1199 = vmatpush3.bf16.msra.mxu1 %v1198_v13  ;;  %v143_v23 = vld [vmem:[#allocation5 + $0x48] sm:$0xff]  ;;  %v1204_v24 = vpack.c.bf16 %v242_v20, %v241_v19  ;;  %v244_v26 = vld [vmem:[#allocation7 + $0x38] sm:$0xff]  ;;  %v144_v28 = vld [vmem:[#allocation5 + $0x50] sm:$0xff]  ;;  %v333_v13 = vlaneseq }
  0x84   :  { %1200 = vmatprep.subr.bf16.mxu1 %v1562_v0  ;;  %v1186_v27 = vpack.c.bf16 %v143_v23, %v142_v22  ;;  %v145_v29 = vld [vmem:[#allocation5 + $0x58] sm:$0xff]  ;;  %v1207_v30 = vpack.c.bf16 %v244_v26, %v243_v25  ;;  %v245_v31 = vld [vmem:[#allocation7 + $0x40] sm:$0xff]  ;;  %v246_v32 = vld [vmem:[#allocation7 + $0x48] sm:$0xff] }
  0x85   :  { %1178 = vmatpush3.bf16.msra.mxu0 %v1177_v7  ;;  %v1189_v33 = vpack.c.bf16 %v145_v29, %v144_v28  ;;  %v146_v34 = vld [vmem:[#allocation5 + $0x60] sm:$0xff]  ;;  %v147_v35 = vld [vmem:[#allocation5 + $0x68] sm:$0xff]  ;;  %v1210_v36 = vpack.c.bf16 %v246_v32, %v245_v31  ;;  %v247_v37 = vld [vmem:[#allocation7 + $0x50] sm:$0xff]  ;;  %v334_v14 = vand.u32 127, %v333_v13 }
  0x86   :  { %1179 = vmatprep.subr.bf16.mxu0 %v1562_v0  ;;  %v248_v38 = vld [vmem:[#allocation7 + $0x58] sm:$0xff]  ;;  %v1192_v39 = vpack.c.bf16 %v147_v35, %v146_v34  ;;  %v148_v40 = vld [vmem:[#allocation5 + $0x70] sm:$0xff]  ;;  %v249_v43 = vld [vmem:[#allocation7 + $0x60] sm:$0xff] }
  0x87   :  { %1202 = vmatpush3.bf16.msra.mxu1 %v1201_v18  ;;  %v149_v41 = vld [vmem:[#allocation5 + $0x78] sm:$0xff]  ;;  %v1213_v42 = vpack.c.bf16 %v248_v38, %v247_v37  ;;  %v250_v44 = vld [vmem:[#allocation7 + $0x68] sm:$0xff]  ;;  %v132_v48 = vld [vmem:[#allocation2 + $0x8] sm:$0xff]  ;;  %v339_v15 = vand.u32 15, %v334_v14 }
  0x88   :  { %1203 = vmatprep.subr.bf16.mxu1 %v1562_v0  ;;  %v1195_v45 = vpack.c.bf16 %v149_v41, %v148_v40  ;;  %v1216_v46 = vpack.c.bf16 %v250_v44, %v249_v43  ;;  %v131_v47 = vld [vmem:[#allocation2] sm:$0xff]  ;;  %v133_v49 = vld [vmem:[#allocation2 + $0x10] sm:$0xff]  ;;  %v251_v50 = vld [vmem:[#allocation7 + $0x70] sm:$0xff] }
  0x89   :  { %1181 = vmatpush3.bf16.msra.mxu0 %v1180_v12  ;;  %v252_v51 = vld [vmem:[#allocation7 + $0x78] sm:$0xff]  ;;  %v808_v53 = vld [vmem:[%s1904_s2] ss:$0 sm:$0xff]  ;;  %v369_v63 = vld [vmem:[#allocation10] sm:$0xff]  ;;  %vm1789_vm1 = vcmp.lt.s32.totalorder %v339_v15, 10  ;;  %s1565_s2 = smov [#allocation15]  }
  0x8a   :  { %1182 = vmatprep.subr.bf16.mxu0 %v1562_v0  ;;  %v1219_v52 = vpack.c.bf16 %v252_v51, %v251_v50  ;;  %v370_v2 = vld [vmem:[#allocation10 + $0x8] sm:$0xff]  ;;  %v371_v3 = vld [vmem:[#allocation10 + $0x10] sm:$0xff]  ;;  %v372_v5 = vld [vmem:[#allocation10 + $0x18] sm:$0xff]  ;;  %s789_s15 = sshll.u32 %s1565_s2, 4  ;;  %s790_s15 = int_to_ptr.vmem [resolvable:$true] %s789_s15 }
  0x8b   :  { %1205 = vmatpush3.bf16.msra.mxu1 %v1204_v24  ;;  %v1222_v4 = vpack.c.bf16 %v370_v2, %v369_v63  ;;  %v1225_v6 = vpack.c.bf16 %v372_v5, %v371_v3  ;;  %v373_v7 = vld [vmem:[#allocation10 + $0x20] sm:$0xff]  ;;  %v374_v8 = vld [vmem:[#allocation10 + $0x28] sm:$0xff]  ;;  %v375_v10 = vld [vmem:[#allocation10 + $0x30] sm:$0xff]  ;;  %s1497_s17 = scalar_lea.vmem %s790_s15, 384  ;;  %p1502_p1 = scmp.lt.s32.totalorder %s790_s15, %s790_s15 }
  0x8c   :  { %1206 = vmatprep.subr.bf16.mxu1 %v1562_v0  ;;  %v1228_v9 = vpack.c.bf16 %v374_v8, %v373_v7  ;;  %v376_v11 = vld [vmem:[#allocation10 + $0x38] sm:$0xff]  ;;  %v377_v26 = vld [vmem:[#allocation10 + $0x40] sm:$0xff]  ;;  %v379_v29 = vld [vmem:[#allocation10 + $0x50] sm:$0xff]  ;;  %p1498_p0 = scmp.ne.s32.totalorder %s790_s15, %s1497_s17  ;;  %p1503_p2 = scmp.lt.s32.totalorder %s1497_s17, %s1497_s17 }
  0x8d   :  { %1184 = vmatpush3.bf16.msra.mxu0 %v1183_v21  ;;  %v1231_v12 = vpack.c.bf16 %v376_v11, %v375_v10  ;;  %v381_v32 = vld [vmem:[#allocation10 + $0x60] sm:$0xff]  ;;  %v383_v35 = vld [vmem:[#allocation10 + $0x70] sm:$0xff]  ;;  %v480_v51 = vld [vmem:[#allocation8 + $0x48] sm:$0xff] }
  0x8e   :  { %1185 = vmatprep.subr.bf16.mxu0 %v1562_v0  ;;  %v471_v38 = vld [vmem:[#allocation8] sm:$0xff]  ;;  %v473_v40 = vld [vmem:[#allocation8 + $0x10] sm:$0xff]  ;;  %v484_v7 = vld [vmem:[#allocation8 + $0x68] sm:$0xff]  ;;  %p1504_p3 = por %p1503_p2, %p1502_p1 }
  0x8f   :  { %1208 = vmatpush3.bf16.msra.mxu1 %v1207_v30  ;;  %v380_v30 = vld [vmem:[#allocation10 + $0x58] sm:$0xff]  ;;  %v475_v44 = vld [vmem:[#allocation8 + $0x20] sm:$0xff]  ;;  %v481_v3 = vld [vmem:[#allocation8 + $0x50] sm:$0xff] }
  0x90   :  { %1209 = vmatprep.subr.bf16.mxu1 %v1562_v0  ;;  %v1237_v31 = vpack.c.bf16 %v380_v30, %v379_v29  ;;  %v479_v50 = vld [vmem:[#allocation8 + $0x40] sm:$0xff]  ;;  %v486_v10 = vld [vmem:[#allocation8 + $0x78] sm:$0xff]  ;;  %v568_v13 = vld [vmem:[#allocation13 + $0x8] sm:$0xff]  ;;  %p1505_p4 = pnand %p1504_p3, %p1498_p0 }
  0x91   :  { %1187 = vmatpush3.bf16.msra.mxu0 %v1186_v27  ;;  %v378_v27 = vld [vmem:[#allocation10 + $0x48] sm:$0xff]  ;;  %v569_v14 = vld [vmem:[#allocation13 + $0x10] sm:$0xff]  ;;  %v578_v29 = vld [vmem:[#allocation13 + $0x58] sm:$0xff] }
  0x92   :  { %1188 = vmatprep.subr.bf16.mxu0 %v1562_v0  ;;  %v1234_v28 = vpack.c.bf16 %v378_v27, %v377_v26  ;;  %v576_v26 = vld [vmem:[#allocation13 + $0x48] sm:$0xff]  ;;  %v683_v16 = vld [vmem:[#allocation11 + $0x50] sm:$0xff] }
  0x93   :  { %1211 = vmatpush3.bf16.msra.mxu1 %v1210_v36  ;;  %v384_v36 = vld [vmem:[#allocation10 + $0x78] sm:$0xff] }
  0x94   :  { %1212 = vmatprep.subr.bf16.mxu1 %v1562_v0  ;;  %v1243_v37 = vpack.c.bf16 %v384_v36, %v383_v35  ;;  %v582_v35 = vld [vmem:[#allocation13 + $0x78] sm:$0xff] }
  0x95   :  { %1190 = vmatpush3.bf16.msra.mxu0 %v1189_v33  ;;  %v382_v33 = vld [vmem:[#allocation10 + $0x68] sm:$0xff] }
  0x96   :  { %1191 = vmatprep.subr.bf16.mxu0 %v1562_v0  ;;  %v1240_v34 = vpack.c.bf16 %v382_v33, %v381_v32  ;;  %v580_v32 = vld [vmem:[#allocation13 + $0x68] sm:$0xff] }
  0x97   :  { %1214 = vmatpush3.bf16.msra.mxu1 %v1213_v42  ;;  %v474_v42 = vld [vmem:[#allocation8 + $0x18] sm:$0xff] }
  0x98   :  { %1215 = vmatprep.subr.bf16.mxu1 %v1562_v0  ;;  %v1249_v43 = vpack.c.bf16 %v474_v42, %v473_v40  ;;  %v673_v42 = vld [vmem:[#allocation11] sm:$0xff] }
  0x99   :  { %1193 = vmatpush3.bf16.msra.mxu0 %v1192_v39  ;;  %v472_v39 = vld [vmem:[#allocation8 + $0x8] sm:$0xff] }
  0x9a   :  { %1194 = vmatprep.subr.bf16.mxu0 %v1562_v0  ;;  %v1246_v41 = vpack.c.bf16 %v472_v39, %v471_v38 }
  0x9b   :  { %1217 = vmatpush3.bf16.msra.mxu1 %v1216_v46 }
  0x9c   :  { %1218 = vmatprep.subr.bf16.mxu1 %v1562_v0 }
  0x9d   :  { %1196 = vmatpush3.bf16.msra.mxu0 %v1195_v45  ;;  %v476_v45 = vld [vmem:[#allocation8 + $0x28] sm:$0xff] }
  0x9e   :  { %1221 = vmatprep.subr.bf16.mxu0 %v1562_v0  ;;  %v1252_v46 = vpack.c.bf16 %v476_v45, %v475_v44 }
  0x9f   :  { %1220 = vmatpush3.bf16.msra.mxu1 %v1219_v52  ;;  %v1258_v52 = vpack.c.bf16 %v480_v51, %v479_v50  ;;  %v676_v50 = vld [vmem:[#allocation11 + $0x18] sm:$0xff] }
  0xa0   :  { %960 = vmatmul.mubr.f32.vlgmr.msra.gmra.mrb[0].mxu0 %v131_v47  ;;  %1245 = vmatprep.subr.bf16.mxu1 %v1562_v0  ;;  %v477_v47 = vld [vmem:[#allocation8 + $0x30] sm:$0xff] }
  0xa1   :  { %962 = vmatprep.mubr.msk.f32.mxu0 %vm1563_vm0, %v1564_v1  ;;  %1223 = vmatpush3.bf16.msra.mxu0 %v1222_v4  ;;  %v482_v4 = vld [vmem:[#allocation8 + $0x58] sm:$0xff] }
  0xa2   :  { %1224 = vmatprep.subr.bf16.mxu0 %v1562_v0  ;;  %v1261_v5 = vpack.c.bf16 %v482_v4, %v481_v3  ;;  %v681_v3 = vld [vmem:[#allocation11 + $0x40] sm:$0xff]  ;;  %v682_v4 = vld [vmem:[#allocation11 + $0x48] sm:$0xff] }
  0xa4   :  { %963 = vmatmul.mubr.f32.gmra.mrb[2].mxu0 %v132_v48  ;;  %v478_v48 = vld [vmem:[#allocation8 + $0x38] sm:$0xff] }
  0xa5   :  { %965 = vmatprep.mubr.msk.f32.mxu0 %vm1563_vm0, %v1564_v1  ;;  %1226 = vmatpush3.bf16.msra.mxu0 %v1225_v6  ;;  %v483_v6 = vld [vmem:[#allocation8 + $0x60] sm:$0xff] }
  0xa6   :  { %1227 = vmatprep.subr.bf16.mxu0 %v1562_v0  ;;  %v1264_v8 = vpack.c.bf16 %v484_v7, %v483_v6  ;;  %v685_v7 = vld [vmem:[#allocation11 + $0x60] sm:$0xff] }
  0xa8   :  { %966 = vmatmul.mubr.f32.gmra.mrb[4].mxu0 %v133_v49  ;;  %v1255_v49 = vpack.c.bf16 %v478_v48, %v477_v47 }
  0xa9   :  { %1041 = vmatprep.mubr.msk.f32.mxu0 %vm1563_vm0, %v1564_v1  ;;  %1229 = vmatpush3.bf16.msra.mxu0 %v1228_v9  ;;  %v485_v9 = vld [vmem:[#allocation8 + $0x70] sm:$0xff] }
  0xaa   :  { %1230 = vmatprep.subr.bf16.mxu0 %v1562_v0  ;;  %v1267_v11 = vpack.c.bf16 %v486_v10, %v485_v9  ;;  %v687_v10 = vld [vmem:[#allocation11 + $0x70] sm:$0xff] }
  0xad   :  { %1232 = vmatpush3.bf16.msra.mxu0 %v1231_v12  ;;  %v567_v12 = vld [vmem:[#allocation13] sm:$0xff] }
  0xae   :  { %1233 = vmatprep.subr.bf16.mxu0 %v1562_v0  ;;  %v1270_v15 = vpack.c.bf16 %v568_v13, %v567_v12 }
  0xb1   :  { %1235 = vmatpush3.bf16.msra.mxu0 %v1234_v28  ;;  %v577_v28 = vld [vmem:[#allocation13 + $0x50] sm:$0xff] }
  0xb2   :  { %1236 = vmatprep.subr.bf16.mxu0 %v1562_v0  ;;  %v1285_v30 = vpack.c.bf16 %v578_v29, %v577_v28 }
  0xb5   :  { %1238 = vmatpush3.bf16.msra.mxu0 %v1237_v31  ;;  %v579_v31 = vld [vmem:[#allocation13 + $0x60] sm:$0xff] }
  0xb6   :  { %1239 = vmatprep.subr.bf16.mxu0 %v1562_v0  ;;  %v1288_v33 = vpack.c.bf16 %v580_v32, %v579_v31 }
  0xb9   :  { %1241 = vmatpush3.bf16.msra.mxu0 %v1240_v34  ;;  %v581_v34 = vld [vmem:[#allocation13 + $0x70] sm:$0xff] }
  0xba   :  { %1242 = vmatprep.subr.bf16.mxu0 %v1562_v0  ;;  %v1291_v36 = vpack.c.bf16 %v582_v35, %v581_v34 }
  0xbd   :  { %1244 = vmatpush3.bf16.msra.mxu0 %v1243_v37 }
  0xbe   :  { %1269 = vmatprep.subr.bf16.mxu0 %v1562_v0 }
 0x173   :  { %v223_v54 = vpop.f32.mrb[0].mxu0 }
 0x174   :  { %v224_v55 = vadd.f32 %v808_v53, %v223_v54  ;;  %v961_v56 = vpop.f32.mrb[1].mxu0 }
 0x176   :  { %1001 = vmatmul.mubr.f32.vlgmr.msra.gmra.mrb[0].mxu1 %v224_v55 }
 0x177   :  { %v228_v57 = vpop.f32.mrb[2].mxu0  ;;  %1003 = vmatprep.mubr.msk.f32.mxu1 %vm1563_vm0, %v1564_v1  ;;  %1247 = vmatpush3.bf16.msra.mxu1 %v1246_v41 }
 0x178   :  { %v229_v58 = vadd.f32 %v808_v53, %v228_v57  ;;  %v964_v59 = vpop.f32.mrb[3].mxu0  ;;  %1248 = vmatprep.subr.bf16.mxu1 %v1562_v0 }
 0x17a   :  { %1004 = vmatmul.mubr.f32.gmra.mrb[2].mxu1 %v229_v58 }
 0x17b   :  { %v233_v60 = vpop.f32.mrb[4].mxu0  ;;  %1006 = vmatprep.mubr.msk.f32.mxu1 %vm1563_vm0, %v1564_v1  ;;  %1250 = vmatpush3.bf16.msra.mxu1 %v1249_v43  ;;  %v674_v43 = vld [vmem:[#allocation11 + $0x8] sm:$0xff] }
 0x17c   :  { %v234_v61 = vadd.f32 %v808_v53, %v233_v60  ;;  %v967_v62 = vpop.f32.mrb[5].mxu0  ;;  %1251 = vmatprep.subr.bf16.mxu1 %v1562_v0  ;;  %v1294_v47 = vpack.c.bf16 %v674_v43, %v673_v42 }
 0x17e   :  { %1007 = vmatmul.mubr.f32.gmra.mrb[4].mxu1 %v234_v61 }
 0x17f   :  { %1082 = vmatprep.mubr.msk.f32.mxu1 %vm1563_vm0, %v1564_v1  ;;  %1253 = vmatpush3.bf16.msra.mxu1 %v1252_v46 }
 0x180   :  { %1254 = vmatprep.subr.bf16.mxu1 %v1562_v0 }
 0x183   :  { %1256 = vmatpush3.bf16.msra.mxu1 %v1255_v49  ;;  %v675_v49 = vld [vmem:[#allocation11 + $0x10] sm:$0xff] }
 0x184   :  { %1257 = vmatprep.subr.bf16.mxu1 %v1562_v0 }
 0x187   :  { %1259 = vmatpush3.bf16.msra.mxu1 %v1258_v52 }
 0x188   :  { %1260 = vmatprep.subr.bf16.mxu1 %v1562_v0 }
 0x18b   :  { %1262 = vmatpush3.bf16.msra.mxu1 %v1261_v5  ;;  %v1306_v5 = vpack.c.bf16 %v682_v4, %v681_v3 }
 0x18c   :  { %1263 = vmatprep.subr.bf16.mxu1 %v1562_v0 }
 0x18f   :  { %1265 = vmatpush3.bf16.msra.mxu1 %v1264_v8  ;;  %v686_v8 = vld [vmem:[#allocation11 + $0x68] sm:$0xff] }
 0x190   :  { %1266 = vmatprep.subr.bf16.mxu1 %v1562_v0  ;;  %v1312_v9 = vpack.c.bf16 %v686_v8, %v685_v7 }
 0x193   :  { %1268 = vmatpush3.bf16.msra.mxu1 %v1267_v11  ;;  %v688_v11 = vld [vmem:[#allocation11 + $0x78] sm:$0xff] }
 0x194   :  { %1293 = vmatprep.subr.bf16.mxu1 %v1562_v0  ;;  %v1315_v12 = vpack.c.bf16 %v688_v11, %v687_v10 }
 0x249   :  { %v319_v17 = vpop.f32.mrb[0].mxu1 }
 0x24a   :  { %v1002_v18 = vpop.f32.mrb[1].mxu1  ;;  %v348_v19 = vsel %vm1789_vm1, %v319_v17, -1e+30 }
 0x24b   :  { %351 = vmax.xlane.f32.xlu0 %v348_v19  ;;  %v571_v19 = vld [vmem:[#allocation13 + $0x20] sm:$0xff] }
 0x24d   :  { %v324_v20 = vpop.f32.mrb[2].mxu1 }
 0x24e   :  { %v1005_v21 = vpop.f32.mrb[3].mxu1  ;;  %v349_v22 = vsel %vm1789_vm1, %v324_v20, -1e+30 }
 0x24f   :  { %353 = vmax.xlane.f32.xlu0 %v349_v22  ;;  %v573_v22 = vld [vmem:[#allocation13 + $0x30] sm:$0xff] }
 0x251   :  { %v329_v23 = vpop.f32.mrb[4].mxu1 }
 0x252   :  { %v1008_v24 = vpop.f32.mrb[5].mxu1  ;;  %v350_v25 = vsel %vm1789_vm1, %v329_v23, -1e+30 }
 0x253   :  { %355 = vmax.xlane.f32.xlu1 %v350_v25  ;;  %v575_v25 = vld [vmem:[#allocation13 + $0x40] sm:$0xff] }
 0x254   :  { %v1282_v27 = vpack.c.bf16 %v576_v26, %v575_v25 }
 0x2d8   :  { %v352_v53 = vpop.xlane.xlu0 %351 }
 0x2d9   :  { %v357_v54 = vsub.f32 %v319_v17, %v352_v53  ;;  %v570_v17 = vld [vmem:[#allocation13 + $0x18] sm:$0xff]  ;;  %v1297_v53 = vpack.c.bf16 %v676_v50, %v675_v49 }
 0x2da   :  { %v1273_v18 = vpack.c.bf16 %v570_v17, %v569_v14 }
 0x2db   :  { %v360_v55 = vmul.f32 1.442695, %v357_v54 }
 0x2dc   :  { %v354_v56 = vpop.xlane.xlu0 %353 }
 0x2dd   :  { %1331 = vpow2.f32 %v360_v55  ;;  %v358_v57 = vsub.f32 %v324_v20, %v354_v56  ;;  %v572_v20 = vld [vmem:[#allocation13 + $0x28] sm:$0xff]  ;;  %v677_v55 = vld [vmem:[#allocation11 + $0x20] sm:$0xff] }
 0x2de   :  { %v1276_v21 = vpack.c.bf16 %v572_v20, %v571_v19  ;;  %v678_v56 = vld [vmem:[#allocation11 + $0x28] sm:$0xff] }
 0x2df   :  { %v362_v58 = vmul.f32 1.442695, %v358_v57 }
 0x2e0   :  { %v356_v59 = vpop.xlane.xlu1 %355 }
 0x2e1   :  { %1333 = vpow2.f32 %v362_v58  ;;  %v359_v60 = vsub.f32 %v329_v23, %v356_v59  ;;  %v574_v23 = vld [vmem:[#allocation13 + $0x38] sm:$0xff]  ;;  %v1300_v59 = vpack.c.bf16 %v678_v56, %v677_v55 }
 0x2e2   :  { %v1279_v24 = vpack.c.bf16 %v574_v23, %v573_v22 }
 0x2e3   :  { %v364_v61 = vmul.f32 1.442695, %v359_v60 }
 0x2e5   :  { %1335 = vpow2.f32 %v364_v61  ;;  %v679_v61 = vld [vmem:[#allocation11 + $0x30] sm:$0xff] }
 0x2e7   :  { %v1808_v62 = vpop.eup %1331 }
 0x2e8   :  { %1042 = vmatmul.mubr.msk.f32.vlgmr.msra.gmra.mrb[6].mxu0 %vm1789_vm1, %v1808_v62  ;;  %v366_v46 = vsel %vm1789_vm1, %v1808_v62, 0.0  ;;  %v680_v62 = vld [vmem:[#allocation11 + $0x38] sm:$0xff] }
 0x2e9   :  { %1044 = vmatprep.mubr.msk.f32.mxu0 %vm1563_vm0, %v1564_v1  ;;  %1271 = vmatpush3.bf16.msra.mxu0 %v1270_v15 }
 0x2ea   :  { %1272 = vmatprep.subr.bf16.mxu0 %v1562_v0 }
 0x2eb   :  { %v1815_v63 = vpop.eup %1333 }
 0x2ec   :  { %1045 = vmatmul.mubr.msk.f32.gmra.mrb[8].mxu0 %vm1789_vm1, %v1815_v63  ;;  %v367_v52 = vsel %vm1789_vm1, %v1815_v63, 0.0  ;;  %v1303_v63 = vpack.c.bf16 %v680_v62, %v679_v61 }
 0x2ed   :  { %1047 = vmatprep.mubr.msk.f32.mxu0 %vm1563_vm0, %v1564_v1  ;;  %1274 = vmatpush3.bf16.msra.mxu0 %v1273_v18 }
 0x2ee   :  { %1275 = vmatprep.subr.bf16.mxu0 %v1562_v0 }
 0x2ef   :  { %v1822_v2 = vpop.eup %1335 }
 0x2f0   :  { %1048 = vmatmul.mubr.msk.f32.gmra.mrb[10].mxu0 %vm1789_vm1, %v1822_v2  ;;  %v368_v58 = vsel %vm1789_vm1, %v1822_v2, 0.0  ;;  %v684_v2 = vld [vmem:[#allocation11 + $0x58] sm:$0xff] }
 0x2f1   :  { %1123 = vmatprep.mubr.msk.f32.mxu0 %vm1563_vm0, %v1564_v1  ;;  %1277 = vmatpush3.bf16.msra.mxu0 %v1276_v21  ;;  %v1309_v6 = vpack.c.bf16 %v684_v2, %v683_v16 }
 0x2f2   :  { %1278 = vmatprep.subr.bf16.mxu0 %v1562_v0 }
 0x2f5   :  { %1280 = vmatpush3.bf16.msra.mxu0 %v1279_v24 }
 0x2f6   :  { %1281 = vmatprep.subr.bf16.mxu0 %v1562_v0 }
 0x2f9   :  { %1283 = vmatpush3.bf16.msra.mxu0 %v1282_v27 }
 0x2fa   :  { %1284 = vmatprep.subr.bf16.mxu0 %v1562_v0 }
 0x2fd   :  { %1286 = vmatpush3.bf16.msra.mxu0 %v1285_v30 }
 0x2fe   :  { %1287 = vmatprep.subr.bf16.mxu0 %v1562_v0 }
 0x301   :  { %1289 = vmatpush3.bf16.msra.mxu0 %v1288_v33 }
 0x302   :  { %1290 = vmatprep.subr.bf16.mxu0 %v1562_v0 }
 0x305   :  { %1292 = vmatpush3.bf16.msra.mxu0 %v1291_v36 }
 0x3bb   :  { %v451_v37 = vpop.f32.mrb[6].mxu0 }
 0x3bc   :  { %1337 = vrcp.f32 %v451_v37  ;;  %v1043_v38 = vpop.f32.mrb[7].mxu0 }
 0x3bf   :  { %v456_v39 = vpop.f32.mrb[8].mxu0 }
 0x3c0   :  { %1339 = vrcp.f32 %v456_v39  ;;  %v1046_v40 = vpop.f32.mrb[9].mxu0 }
 0x3c3   :  { %v461_v41 = vpop.f32.mrb[10].mxu0 }
 0x3c4   :  { %1341 = vrcp.f32 %v461_v41  ;;  %v1049_v44 = vpop.f32.mrb[11].mxu0 }
 0x3c6   :  { %v1338_v45 = vpop.eup %1337 }
 0x3c7   :  { %v468_v48 = vmul.f32 %v1338_v45, %v366_v46 }
 0x3c9   :  { %1083 = vmatmul.mubr.f32.vlgmr.msra.gmra.mrb[6].mxu1 %v468_v48 }
 0x3ca   :  { %v1340_v51 = vpop.eup %1339  ;;  %1295 = vmatpush3.bf16.msra.mxu1 %v1294_v47  ;;  %1085 = vmatprep.mubr.msk.f32.mxu1 %vm1563_vm0, %v1564_v1 }
 0x3cb   :  { %1296 = vmatprep.subr.bf16.mxu1 %v1562_v0  ;;  %v469_v54 = vmul.f32 %v1340_v51, %v367_v52 }
 0x3cd   :  { %1086 = vmatmul.mubr.f32.gmra.mrb[8].mxu1 %v469_v54 }
 0x3ce   :  { %v1342_v57 = vpop.eup %1341  ;;  %1298 = vmatpush3.bf16.msra.mxu1 %v1297_v53  ;;  %1088 = vmatprep.mubr.msk.f32.mxu1 %vm1563_vm0, %v1564_v1 }
 0x3cf   :  { %1299 = vmatprep.subr.bf16.mxu1 %v1562_v0  ;;  %v470_v60 = vmul.f32 %v1342_v57, %v368_v58 }
 0x3d1   :  { %1089 = vmatmul.mubr.f32.gmra.mrb[10].mxu1 %v470_v60 }
 0x3d2   :  { %1301 = vmatpush3.bf16.msra.mxu1 %v1300_v59  ;;  %1164 = vmatprep.mubr.msk.f32.mxu1 %vm1563_vm0, %v1564_v1 }
 0x3d3   :  { %1302 = vmatprep.subr.bf16.mxu1 %v1562_v0 }
 0x3d6   :  { %1304 = vmatpush3.bf16.msra.mxu1 %v1303_v63 }
 0x3d7   :  { %1305 = vmatprep.subr.bf16.mxu1 %v1562_v0 }
 0x3da   :  { %1307 = vmatpush3.bf16.msra.mxu1 %v1306_v5 }
 0x3db   :  { %1308 = vmatprep.subr.bf16.mxu1 %v1562_v0 }
 0x3de   :  { %1310 = vmatpush3.bf16.msra.mxu1 %v1309_v6 }
 0x3df   :  { %1311 = vmatprep.subr.bf16.mxu1 %v1562_v0 }
 0x3e2   :  { %1313 = vmatpush3.bf16.msra.mxu1 %v1312_v9 }
 0x3e3   :  { %1314 = vmatprep.subr.bf16.mxu1 %v1562_v0 }
 0x3e6   :  { %1316 = vmatpush3.bf16.msra.mxu1 %v1315_v12 }
 0x3e9   :  { %1165 = vmatmul.mubr.f32.vlgmr.msra.gmra.mrb[12].mxu1 %v468_v48 }
 0x3ea   :  { %1167 = vmatprep.mubr.msk.f32.mxu1 %vm1563_vm0, %v1564_v1 }
 0x3ed   :  { %1168 = vmatmul.mubr.f32.gmra.mrb[14].mxu1 %v469_v54 }
 0x3ee   :  { %1170 = vmatprep.mubr.msk.f32.mxu1 %vm1563_vm0, %v1564_v1 }
 0x3f1   :  { %1171 = vmatmul.mubr.f32.gmra.mrb[16].mxu1 %v470_v60 }
 0x49c   :  { %v553_v13 = vpop.f32.mrb[6].mxu1 }
 0x49d   :  { %v1084_v14 = vpop.f32.mrb[7].mxu1  ;;  %1124 = vmatmul.mubr.f32.vlgmr.msra.gmra.mrb[12].mxu0 %v553_v13 }
 0x49e   :  { %1126 = vmatprep.mubr.msk.f32.mxu0 %vm1563_vm0, %v1564_v1 }
 0x4a0   :  { %v558_v15 = vpop.f32.mrb[8].mxu1 }
 0x4a1   :  { %v1087_v17 = vpop.f32.mrb[9].mxu1  ;;  %1127 = vmatmul.mubr.f32.gmra.mrb[14].mxu0 %v558_v15 }
 0x4a2   :  { %1129 = vmatprep.mubr.msk.f32.mxu0 %vm1563_vm0, %v1564_v1 }
 0x4a4   :  { %v563_v0 = vpop.f32.mrb[10].mxu1 }
 0x4a5   :  { %v1090_v18 = vpop.f32.mrb[11].mxu1  ;;  %1130 = vmatmul.mubr.f32.gmra.mrb[16].mxu0 %v563_v0 }
 0x4bc   :  { %v755_v19 = vpop.f32.mrb[12].mxu1 }
 0x4bd   :  { %769 = vst [vmem:[#allocation15] sm:$0xff] %v755_v19  ;;  %v1166_v20 = vpop.f32.mrb[13].mxu1 }
 0x4c0   :  { %v760_v21 = vpop.f32.mrb[14].mxu1 }
 0x4c1   :  { %770 = vst [vmem:[#allocation15 + $0x8] sm:$0xff] %v760_v21  ;;  %v1169_v22 = vpop.f32.mrb[15].mxu1 }
 0x4c4   :  { %v765_v23 = vpop.f32.mrb[16].mxu1 }
 0x4c5   :  { %771 = vst [vmem:[#allocation15 + $0x10] sm:$0xff] %v765_v23  ;;  %v1172_v24 = vpop.f32.mrb[17].mxu1 }
 0x4c6   :  { %1508 = shalt.err (!%p1505_p4)
}
 0x4c7   :  { %s1509_s14 = scalar_lea.hbm %s1912_s10, 384 }
 0x4c8   :  { %p1510_p5 = scmp.ne.s32.totalorder %s1912_s10, %s1509_s14  ;;  %p1513_p6 = scmp.lt.u32.totalorder %s1509_s14, %s1912_s10 }
 0x4ca   :  { %p1515_p7 = pnand %p1513_p6, %p1510_p5 }
 0x4cc   :  { %1518 = shalt.err (!%p1515_p7)
}
 0x4cd   :  { %795 = dma.vmem_to_hbm [thread:$0]  %s790_s15, 384, %s1912_s10, [#allocation16], %s1555_s25, %s1555_s25, %s1556_s26  }
 0x4ce   :  { %v812_v1 = vld [vmem:[%s1910_s8] ss:$0 sm:$0xff]  ;;  %s1566_s29 = smov [#allocation14]  }
 0x4cf   :  { %s777_s30 = sshll.u32 %s1566_s29, 4  ;;  %s778_s30 = int_to_ptr.vmem [resolvable:$true] %s777_s30 }
 0x4d0   :  { %s1519_s10 = scalar_lea.vmem %s778_s30, 384  ;;  %p1524_p9 = scmp.lt.s32.totalorder %s778_s30, %s778_s30 }
 0x4d1   :  { %p1520_p8 = scmp.ne.s32.totalorder %s778_s30, %s1519_s10  ;;  %p1525_p10 = scmp.lt.s32.totalorder %s1519_s10, %s1519_s10 }
 0x4d3   :  { %p1526_p11 = por %p1525_p10, %p1524_p9 }
 0x4d5   :  { %p1527_p12 = pnand %p1526_p11, %p1520_p8 }
 0x570   :  { %v656_v25 = vpop.f32.mrb[12].mxu0 }
 0x571   :  { %v657_v26 = vadd.f32 %v812_v1, %v656_v25  ;;  %v1125_v27 = vpop.f32.mrb[13].mxu0 }
 0x573   :  { %670 = vst [vmem:[#allocation14] sm:$0xff] %v657_v26 }
 0x574   :  { %v661_v28 = vpop.f32.mrb[14].mxu0 }
 0x575   :  { %v662_v29 = vadd.f32 %v812_v1, %v661_v28  ;;  %v1128_v30 = vpop.f32.mrb[15].mxu0 }
 0x577   :  { %671 = vst [vmem:[#allocation14 + $0x8] sm:$0xff] %v662_v29 }
 0x578   :  { %v666_v31 = vpop.f32.mrb[16].mxu0 }
 0x579   :  { %v667_v32 = vadd.f32 %v812_v1, %v666_v31  ;;  %v1131_v33 = vpop.f32.mrb[17].mxu0 }
 0x57b   :  { %672 = vst [vmem:[#allocation14 + $0x10] sm:$0xff] %v667_v32 }
 0x57c   :  { %1530 = shalt.err (!%p1527_p12)
}
 0x57d   :  { %s1531_s4 = scalar_lea.hbm %s1911_s9, 384 }
 0x57e   :  { %p1532_p13 = scmp.ne.s32.totalorder %s1911_s9, %s1531_s4  ;;  %p1535_p0 = scmp.lt.u32.totalorder %s1531_s4, %s1911_s9 }
 0x580   :  { %p1537_p1 = pnand %p1535_p0, %p1532_p13 }
 0x582   :  { %1540 = shalt.err (!%p1537_p1)
}
 0x583   :  { %783 = dma.vmem_to_hbm [thread:$0]  %s778_s30, 384, %s1911_s9, [#allocation4], %s1555_s25, %s1555_s25, %s1556_s26  }
 0x584   :  { %1549 = dma.done.wait [#allocation4], 384  }
 0x585   :  { %1550 = vsyncadd [#allocation4], 4294966912 }
 0x586   :  { %1551 = dma.done.wait [#allocation16], 384  }
 0x587   :  { %1552 = vsyncadd [#allocation16], 4294966912 }
 0x588   :  { %802 = vsyncpa [#allocation3], 1 }
 0x589   :  { %803 = vsyncpa [#allocation6], 1 }
 0x58a   :  { %804 = vsyncpa [#allocation9], 1 }
 0x58b   :  { %805 = vsyncpa [#allocation12], 1 }
 0x58c   :  { %806 = vsyncpa [#allocation4], 1 }
 0x58d   :  { %807 = vsyncpa [#allocation16], 1 }

</bundles_post_ra>
